<compile_context>
chip_gen: v5e
topology: v5e:2x2
jax: 0.10.0
libtpu: 0.0.40
codegen_flags: <defaults>
</compile_context>

<pallas_src>
import jax
import jax.numpy as jnp
import numpy as np
from jax.experimental import pallas as pl
from jax.experimental.pallas import tpu as pltpu


def _round_up(x, m):
    return (x + m - 1) // m * m


# ------------- Kernel 1: h1 = relu((A @ X) @ W1s + b1), K-tiled aggregation ----------
def conv1_kernel(a_ref, x_ref, w1_ref, b1_ref, h1_ref, acc_ref):
    k = pl.program_id(1)

    @pl.when(k == 0)
    def _():
        acc_ref[...] = jnp.zeros_like(acc_ref)

    # int8 A tile -> bf16 on the VPU (dequant scale folded into W1); f32 accumulation.
    a_bf = a_ref[...].astype(jnp.float32).astype(jnp.bfloat16)
    acc_ref[...] += jnp.dot(a_bf, x_ref[...], preferred_element_type=jnp.float32)

    @pl.when(k == pl.num_programs(1) - 1)
    def _():
        h = jnp.dot(acc_ref[...].astype(jnp.bfloat16), w1_ref[...],
                    preferred_element_type=jnp.float32) + b1_ref[...]
        h1_ref[...] = jnp.maximum(h, 0.0).astype(h1_ref.dtype)


# ------ Kernel 2 (fused): conv2 + Linear(hidden,10) + mean_nodes + sigmoid head ------
def conv2_fused_kernel(a_ref, h1_ref, w2_ref, b2_ref, w3_ref, b3_ref,
                       p_ref, w4_ref, b4_ref, out_ref, acc_ref, hg_ref):
    i = pl.program_id(0)
    k = pl.program_id(1)
    last_i = pl.num_programs(0) - 1
    last_k = pl.num_programs(1) - 1

    @pl.when((i == 0) & (k == 0))
    def _():
        hg_ref[...] = jnp.zeros_like(hg_ref)      # pooled features, whole grid

    @pl.when(k == 0)
    def _():
        acc_ref[...] = jnp.zeros_like(acc_ref)    # A @ h1 accumulator, per row tile

    a_bf = a_ref[...].astype(jnp.float32).astype(jnp.bfloat16)
    acc_ref[...] += jnp.dot(a_bf, h1_ref[...], preferred_element_type=jnp.float32)

    @pl.when(k == last_k)
    def _():
        h = jnp.dot(acc_ref[...].astype(jnp.bfloat16), w2_ref[...],
                    preferred_element_type=jnp.float32) + b2_ref[...]
        h = jnp.maximum(h, 0.0)
        h = jnp.dot(h.astype(jnp.bfloat16), w3_ref[...],
                    preferred_element_type=jnp.float32) + b3_ref[...]
        h3 = jnp.maximum(h, 0.0)
        # mean-pool partial for this row tile (P rows are already 1/n_g weighted).
        hg_ref[...] += jnp.dot(p_ref[...], h3.astype(jnp.bfloat16),
                               preferred_element_type=jnp.float32)

    @pl.when((i == last_i) & (k == last_k))
    def _():
        logits = jnp.dot(hg_ref[...], w4_ref[...],
                         preferred_element_type=jnp.float32) + b4_ref[...]
        out_ref[...] = jax.nn.sigmoid(logits)


def classifier_forward(a_norm, x, params, pool, *, tile=512):
    """Full forward pass. `tile` is the square A-tile edge (multiple of 128)."""
    N = a_norm.shape[0]
    G = pool.shape[0]
    in_dim = x.shape[1]
    H = params["w1"].shape[1]
    lin_dim = params["w3"].shape[1]          # 10
    n_classes = params["w4"].shape[1]

    assert tile % 128 == 0, "tile must be a multiple of 128 (lane width)"
    t = min(tile, _round_up(N, 128))         # square A tile; VMEM use is N-independent
    n_pad = _round_up(N, t)
    grid = (n_pad // t, n_pad // t)          # (row tiles, contraction tiles)

    # --- symmetric per-tensor int8 quantization of the normalized adjacency ---
    a_max = jnp.maximum(jnp.max(jnp.abs(a_norm)), 1e-30)
    a_scale = a_max / 127.0
    a_q = jnp.clip(jnp.round(a_norm / a_scale), -127, 127).astype(jnp.int8)
    a_p = jnp.zeros((n_pad, n_pad), jnp.int8).at[:N, :N].set(a_q)

    # Zero-padded node features / pooling matrix.  Padded nodes have zero
    # adjacency columns and zero pooling weight, so they cannot affect outputs.
    x_p = jnp.zeros((n_pad, in_dim), jnp.bfloat16).at[:N, :].set(x.astype(jnp.bfloat16))
    p_p = jnp.zeros((G, n_pad), jnp.bfloat16).at[:, :N].set(pool.astype(jnp.bfloat16))

    # Fold the dequantization scale into W1 / W2; feature matmuls run in bf16.
    w1 = (params["w1"] * a_scale).astype(jnp.bfloat16)
    w2 = (params["w2"] * a_scale).astype(jnp.bfloat16)
    w3 = params["w3"].astype(jnp.bfloat16)
    b1, b2, b3 = params["b1"], params["b2"], params["b3"]
    w4, b4 = params["w4"], params["b4"]

    # Per-generation scoped-VMEM budget: query the chip, leave ~8 MiB headroom.
    try:
        vmem_cap = pltpu.get_tpu_info().vmem_capacity_bytes
    except Exception:
        vmem_cap = 64 << 20                  # conservative fallback (v7x per-core)
    vmem_limit = int(min(max(vmem_cap - (8 << 20), 16 << 20), 112 << 20))

    conv1_cp = pltpu.CompilerParams(
        dimension_semantics=("parallel", "arbitrary"),
        vmem_limit_bytes=vmem_limit,
    )
    conv2_cp = pltpu.CompilerParams(
        # pooled-feature accumulator crosses row tiles -> both axes "arbitrary".
        dimension_semantics=("arbitrary", "arbitrary"),
        vmem_limit_bytes=vmem_limit,
    )

    # ---- GraphConv 1: h1 = relu(A @ X @ W1 + b1) ----
    h1 = pl.pallas_call(
        conv1_kernel,
        out_shape=jax.ShapeDtypeStruct((n_pad, H), jnp.bfloat16),
        grid=grid,
        in_specs=[
            pl.BlockSpec((t, t), lambda i, k: (i, k)),          # A tile (int8)
            pl.BlockSpec((t, in_dim), lambda i, k: (k, 0)),     # X contraction slice
            pl.BlockSpec((in_dim, H), lambda i, k: (0, 0)),     # W1 (scaled, bf16)
            pl.BlockSpec((1, H), lambda i, k: (0, 0)),          # b1
        ],
        out_specs=pl.BlockSpec((t, H), lambda i, k: (i, 0)),
        scratch_shapes=[pltpu.VMEM((t, in_dim), jnp.float32)],
        compiler_params=conv1_cp,
    )(a_p, x_p, w1, b1)

    # ---- GraphConv 2 + Linear(hidden,10) + mean_nodes + classify head (fused) ----
    out = pl.pallas_call(
        conv2_fused_kernel,
        out_shape=jax.ShapeDtypeStruct((G, n_classes), jnp.float32),
        grid=grid,
        in_specs=[
            pl.BlockSpec((t, t), lambda i, k: (i, k)),          # A tile (int8)
            pl.BlockSpec((t, H), lambda i, k: (k, 0)),          # h1 contraction slice
            pl.BlockSpec((H, H), lambda i, k: (0, 0)),          # W2 (scaled, bf16)
            pl.BlockSpec((1, H), lambda i, k: (0, 0)),          # b2
            pl.BlockSpec((H, lin_dim), lambda i, k: (0, 0)),    # W3 (bf16)
            pl.BlockSpec((1, lin_dim), lambda i, k: (0, 0)),    # b3
            pl.BlockSpec((G, t), lambda i, k: (0, i)),          # pooling slice (bf16)
            pl.BlockSpec((lin_dim, n_classes), lambda i, k: (0, 0)),  # W4
            pl.BlockSpec((1, n_classes), lambda i, k: (0, 0)),  # b4
        ],
        out_specs=pl.BlockSpec((G, n_classes), lambda i, k: (0, 0)),
        scratch_shapes=[pltpu.VMEM((t, H), jnp.float32),        # A @ h1 accumulator
                        pltpu.VMEM((G, lin_dim), jnp.float32)], # pooled features
        compiler_params=conv2_cp,
    )(a_p, h1, w2, b2, w3, b3, p_p, w4, b4)
    return out


def build_graph(num_nodes_per_graph):
    """Build a batched graph (undirected ring graphs); return (A_norm, pool)."""
    offsets = np.cumsum([0] + list(num_nodes_per_graph))
    N = offsets[-1]
    G = len(num_nodes_per_graph)
    A = np.zeros((N, N), dtype=np.float32)            # A[dst, src]
    for g, n in enumerate(num_nodes_per_graph):
        base = offsets[g]
        for i in range(n):
            j = (i + 1) % n
            A[base + i, base + j] = 1.0
            A[base + j, base + i] = 1.0
    out_deg = np.clip(A.sum(axis=0), 1.0, None)       # src out-degree
    in_deg = np.clip(A.sum(axis=1), 1.0, None)        # dst in-degree
    A_norm = (in_deg[:, None] ** -0.5) * A * (out_deg[None, :] ** -0.5)
    pool = np.zeros((G, N), dtype=np.float32)
    for g, n in enumerate(num_nodes_per_graph):
        pool[g, offsets[g]:offsets[g] + n] = 1.0 / n
    return jnp.asarray(A_norm), jnp.asarray(pool)


def init_params(key, in_dim, hidden_dim, n_classes):
    ks = jax.random.split(key, 8)
    scale = 0.1
    return {
        "w1": scale * jax.random.normal(ks[0], (in_dim, hidden_dim), jnp.float32),
        "b1": scale * jax.random.normal(ks[1], (1, hidden_dim), jnp.float32),
        "w2": scale * jax.random.normal(ks[2], (hidden_dim, hidden_dim), jnp.float32),
        "b2": scale * jax.random.normal(ks[3], (1, hidden_dim), jnp.float32),
        "w3": scale * jax.random.normal(ks[4], (hidden_dim, 10), jnp.float32),
        "b3": scale * jax.random.normal(ks[5], (1, 10), jnp.float32),
        "w4": scale * jax.random.normal(ks[6], (10, n_classes), jnp.float32),
        "b4": scale * jax.random.normal(ks[7], (1, n_classes), jnp.float32),
    }


def reference_forward(a_norm, x, params, pool):
    """Pure-JAX f32 reference of the same forward pass."""
    h = jnp.maximum(a_norm @ x @ params["w1"] + params["b1"], 0.0)
    h = jnp.maximum(a_norm @ h @ params["w2"] + params["b2"], 0.0)
    h = jnp.maximum(h @ params["w3"] + params["b3"], 0.0)
    hg = pool @ h
    return jax.nn.sigmoid(hg @ params["w4"] + params["b4"])


if __name__ == "__main__":
    in_dim, hidden_dim, n_classes = 8, 32, 4
    # Batched graph of 10 ring graphs, N = 312 nodes total -> padded to 384 with
    # tile=128, exercising the 3x3 (row-tile, contraction-tile) grid, the
    # int8-A path, and the zero-padding path.
    num_nodes_per_graph = [23, 31, 40, 28, 35, 26, 37, 29, 33, 30]

    a_norm, pool = build_graph(num_nodes_per_graph)
    N = a_norm.shape[0]

    key = jax.random.PRNGKey(0)
    k_x, k_p = jax.random.split(key)
    x = jax.random.normal(k_x, (N, in_dim), jnp.float32)
    params = init_params(k_p, in_dim, hidden_dim, n_classes)

    out = classifier_forward(a_norm, x, params, pool, tile=128)
    out = jax.block_until_ready(out)

    ref = reference_forward(a_norm, x, params, pool)
    # int8 A (max-scaled) + bf16 activations/weights in the kernel -> loose tolerance.
    np.testing.assert_allclose(np.asarray(out), np.asarray(ref), rtol=2e-2, atol=2e-2)
    assert out.shape == (len(num_nodes_per_graph), n_classes)
    print("KERNEL_OK")
</pallas_src>

<mosaic_0001>
module attributes {stable_mosaic.version = 11 : i64} {
  func.func @conv1_kernel(%arg0: i32, %arg1: i32, %arg2: memref<128x128xi8, #tpu.memory_space<vmem>>, %arg3: memref<128x8xbf16, #tpu.memory_space<vmem>>, %arg4: memref<8x32xbf16, #tpu.memory_space<vmem>>, %arg5: memref<1x32xf32, #tpu.memory_space<vmem>>, %arg6: memref<128x32xbf16, #tpu.memory_space<vmem>>, %arg7: memref<128x8xf32, #tpu.memory_space<vmem>>) attributes {dimension_semantics = [#tpu.dimension_semantics<parallel>, #tpu.dimension_semantics<arbitrary>], iteration_bounds = array<i64: 3, 3>, scalar_prefetch = 0 : i64, scratch_operands = 1 : i64, tpu.core_type = #tpu.core_type<tc>, window_params = [{transform_indices = @transform_0, window_bounds = array<i64: 128, 128>}, {transform_indices = @transform_1, window_bounds = array<i64: 128, 8>}, {pipeline_mode = #tpu.pipeline_mode<synchronous>, transform_indices = @transform_2, window_bounds = array<i64: 8, 32>}, {pipeline_mode = #tpu.pipeline_mode<synchronous>, transform_indices = @transform_3, window_bounds = array<i64: 1, 32>}, {transform_indices = @transform_4, window_bounds = array<i64: 128, 32>}]} {
    %c0_i32 = arith.constant 0 : i32
    %0 = arith.cmpi eq, %arg1, %c0_i32 : i32
    %1 = arith.extui %0 : i1 to i32
    %c0_i32_0 = arith.constant 0 : i32
    %2 = arith.cmpi ne, %1, %c0_i32_0 : i32
    scf.if %2 {
      %cst_9 = arith.constant 0.000000e+00 : f32
      %14 = vector.broadcast %cst_9 : f32 to vector<128x8xf32>
      %c0_10 = arith.constant 0 : index
      %c0_11 = arith.constant 0 : index
      %15 = vector.load %arg7[%c0_10, %c0_11] : memref<128x8xf32, #tpu.memory_space<vmem>>, vector<128x8xf32>
      tpu.vector_store %arg7[%c0_10, %c0_11], %14 {strides = array<i32>} : memref<128x8xf32, #tpu.memory_space<vmem>>, vector<128x8xf32>,
    } else {
    }
    %c0 = arith.constant 0 : index
    %c0_1 = arith.constant 0 : index
    %3 = vector.load %arg2[%c0, %c0_1] : memref<128x128xi8, #tpu.memory_space<vmem>>, vector<128x128xi8>
    %4 = arith.sitofp %3 : vector<128x128xi8> to vector<128x128xf32>
    %5 = arith.truncf %4 : vector<128x128xf32> to vector<128x128xbf16>
    %c0_2 = arith.constant 0 : index
    %c0_3 = arith.constant 0 : index
    %6 = vector.load %arg7[%c0_2, %c0_3] : memref<128x8xf32, #tpu.memory_space<vmem>>, vector<128x8xf32>
    %c0_4 = arith.constant 0 : index
    %c0_5 = arith.constant 0 : index
    %7 = vector.load %arg3[%c0_4, %c0_5] : memref<128x8xbf16, #tpu.memory_space<vmem>>, vector<128x8xbf16>
    %cst = arith.constant dense<0.000000e+00> : vector<128x8xf32>
    %8 = tpu.matmul %5, %7, %cst {dimension_numbers = #tpu.dot_dimension_numbers<[1], [0], [0], [1], [0, 0, 1, 1], [], []>} : vector<128x128xbf16>, vector<128x8xbf16>, vector<128x8xf32> -> vector<128x8xf32>
    %9 = arith.addf %6, %8 : vector<128x8xf32>
    %c0_6 = arith.constant 0 : index
    %c0_7 = arith.constant 0 : index
    %10 = vector.load %arg7[%c0_6, %c0_7] : memref<128x8xf32, #tpu.memory_space<vmem>>, vector<128x8xf32>
    tpu.vector_store %arg7[%c0_6, %c0_7], %9 {strides = array<i32>} : memref<128x8xf32, #tpu.memory_space<vmem>>, vector<128x8xf32>,
    %c2_i32 = arith.constant 2 : i32
    %11 = arith.cmpi eq, %arg1, %c2_i32 : i32
    %12 = arith.extui %11 : i1 to i32
    %c0_i32_8 = arith.constant 0 : i32
    %13 = arith.cmpi ne, %12, %c0_i32_8 : i32
    scf.if %13 {
      %c0_9 = arith.constant 0 : index
      %c0_10 = arith.constant 0 : index
      %14 = vector.load %arg7[%c0_9, %c0_10] : memref<128x8xf32, #tpu.memory_space<vmem>>, vector<128x8xf32>
      %15 = arith.truncf %14 : vector<128x8xf32> to vector<128x8xbf16>
      %c0_11 = arith.constant 0 : index
      %c0_12 = arith.constant 0 : index
      %16 = vector.load %arg4[%c0_11, %c0_12] : memref<8x32xbf16, #tpu.memory_space<vmem>>, vector<8x32xbf16>
      %cst_13 = arith.constant dense<0.000000e+00> : vector<128x32xf32>
      %17 = tpu.matmul %15, %16, %cst_13 {dimension_numbers = #tpu.dot_dimension_numbers<[1], [0], [0], [1], [0, 0, 1, 1], [], []>} : vector<128x8xbf16>, vector<8x32xbf16>, vector<128x32xf32> -> vector<128x32xf32>
      %c0_14 = arith.constant 0 : index
      %c0_15 = arith.constant 0 : index
      %18 = vector.load %arg5[%c0_14, %c0_15] : memref<1x32xf32, #tpu.memory_space<vmem>>, vector<1x32xf32>
      %19 = vector.broadcast %18 : vector<1x32xf32> to vector<128x32xf32>
      %20 = arith.addf %17, %19 : vector<128x32xf32>
      %cst_16 = arith.constant 0.000000e+00 : f32
      %21 = vector.broadcast %cst_16 : f32 to vector<128x32xf32>
      %22 = arith.maximumf %20, %21 : vector<128x32xf32>
      %23 = arith.truncf %22 : vector<128x32xf32> to vector<128x32xbf16>
      %c0_17 = arith.constant 0 : index
      %c0_18 = arith.constant 0 : index
      %24 = vector.load %arg6[%c0_17, %c0_18] : memref<128x32xbf16, #tpu.memory_space<vmem>>, vector<128x32xbf16>
      tpu.vector_store %arg6[%c0_17, %c0_18], %23 {strides = array<i32>} : memref<128x32xbf16, #tpu.memory_space<vmem>>, vector<128x32xbf16>,
    } else {
    }
    return
  }
  func.func @transform_0(%arg0: i32, %arg1: i32) -> (i32, i32) {
    %c0_i32 = arith.constant 0 : i32
    return %arg0, %arg1 : i32, i32
  }
  func.func @transform_1(%arg0: i32, %arg1: i32) -> (i32, i32) {
    %c0_i32 = arith.constant 0 : i32
    %c0_i32_0 = arith.constant 0 : i32
    return %arg1, %c0_i32 : i32, i32
  }
  func.func @transform_2(%arg0: i32, %arg1: i32) -> (i32, i32) {
    %c0_i32 = arith.constant 0 : i32
    %c0_i32_0 = arith.constant 0 : i32
    %c0_i32_1 = arith.constant 0 : i32
    return %c0_i32, %c0_i32_0 : i32, i32
  }
  func.func @transform_3(%arg0: i32, %arg1: i32) -> (i32, i32) {
    %c0_i32 = arith.constant 0 : i32
    %c0_i32_0 = arith.constant 0 : i32
    %c0_i32_1 = arith.constant 0 : i32
    return %c0_i32, %c0_i32_0 : i32, i32
  }
  func.func @transform_4(%arg0: i32, %arg1: i32) -> (i32, i32) {
    %c0_i32 = arith.constant 0 : i32
    %c0_i32_0 = arith.constant 0 : i32
    return %arg0, %c0_i32 : i32, i32
  }
}

</mosaic_0001>

<bundles_post_ra>
// kernel: tpu_custom_call.1
= control target key start
LH: loop header
LB: loop body
LE: loop exit
PB: predicated region body
PF: predicated region fallthrough
CT: control target
= control target key end

     0   :  { %9 = vsyncpa [#allocation4], 0  ;;  %s1269_s0 = inlined_call_operand.hbm [shape: s8[384,384], index: 0, kind: input, shape index: {}]   ;;  %s1270_s1 = inlined_call_operand.vmem [shape: bf16[384,8], index: 1, kind: input, shape index: {}]   ;;  %s1271_s2 = inlined_call_operand.vmem [shape: bf16[8,32], index: 2, kind: input, shape index: {}]   ;;  %s1272_s3 = inlined_call_operand.vmem [shape: f32[1,32], index: 3, kind: input, shape index: {}]   ;;  %s1273_s4 = inlined_call_operand.vmem [shape: bf16[384,32], index: 4, kind: output, shape index: {}]  }
   0x1   :  { %11 = vsyncpa [#allocation4 + $0x1], 0  ;;  %s1037_s15 = smov 0   ;;  %s1039_s16 = smov 0  }
   0x2   :  { %s1041_s17 = smov 0   ;;  %s1043_s18 = smov 0  }
   0x3   :  { %s1045_s19 = smov 0   ;;  %s1047_s20 = smov 0  }
   0x4   :  { %s1049_s21 = smov 0   ;;  %s1051_s22 = smov 0  }
   0x5 LB: > { %s740_s23 = sadd.s32 4294967295, %s1006_s22   ;;  %s26_s24 = sadd.s32 1, %s998_s20  ;;  %s1006_s22 = sphi %s1051_s22, %s17_s22   ;;  %s1002_s21 = sphi %s1049_s21, %s1285_s21   ;;  %s998_s20 = sphi %s1047_s20, %s1284_s20   ;;  %s994_s19 = sphi %s1045_s19, %s1283_s19   ;;  %s990_s18 = sphi %s1043_s18, %s1282_s18   ;;  %s986_s17 = sphi %s1041_s17, %s1281_s17   ;;  %s982_s16 = sphi %s1039_s16, %s1280_s16   ;;  %s978_s15 = sphi %s1037_s15, %s1279_s15  }
   0x6   : > { %p27_p0 = scmp.ge.s32.totalorder %s26_s24, 3  ;;  %s29_s25 = sadd.s32 1, %s1002_s21 }
   0x7   : > { %s38_s26 = sadd.s32 1, %s986_s17  ;;  %p45_p1 = scmp.ne.s32.totalorder %s986_s17, %s982_s16 }
   0x8   : > { %s1287_s24 = smov (%p27_p0, %s26_s24), 0  ;;  %s1289_s25 = smov (!%p27_p0, %s29_s25), %s1002_s21 }
   0x9   : > { %s34_s27 = ssub.s32 %s998_s20, %s1287_s24  ;;  %p46_p2 = scmp.eq.s32.totalorder %s1006_s22, 0 }
   0xa   : > { %p31_p3 = scmp.ge.s32.totalorder %s1289_s25, 3  ;;  %p51_p4 = scmp.ne.s32.totalorder %s982_s16, %s978_s15 }
   0xb   : > { %p1088_p5 = por %p46_p2, %p45_p1  ;;  %p52_p6 = scmp.eq.s32.totalorder %s740_s23, 0 }
   0xc   : > { %s1291_s25 = smov (%p31_p3, %s1289_s25), 0  ;;  %p840_p8 = scmp.lt.s32.totalorder %s1006_s22, 9 }
   0xd   : > { %1276 = sst [smem:[#allocation6_spill]] %s1291_s25  ;;  %p1094_p7 = por %p52_p6, %p51_p4 }
   0xe   : > { %s33_s30 = ssub.s32 %s1002_s21, %s1291_s25  ;;  %s175_s6 = sand.u32 1, %s986_s17  }
   0xf   : > { %s35_s5 = sor.u32 %s34_s27, %s33_s30  ;;  %s744_s7 = sshll.u32 %s175_s6, 5 }
  0x10   : > { %p36_p9 = scmp.eq.s32.totalorder %s35_s5, 0  ;;  %s833_s8 = smul.u32 12, %s1002_s21 }
  0x11   : > { %s179_s12 = scalar_lea.vmem [#allocation3], %s744_s7  ;;  %p837_p10 = pnand %p840_p8, %p1088_p5 }
  0x12   : > { %s1104_s9 = scalar_select %p36_p9, %s986_s17, %s38_s26  }
  0x13   : > { %s184_s10 = sadd.s32 %s998_s20, %s833_s8  ;;  %s189_s13 = sshll.u32 %s179_s12, 4  ;;  %s190_s13 = int_to_ptr.vmem [resolvable:$true] %s189_s13 }
  0x14   : > { %s747_s11 = sshll.u32 %s184_s10, 3  ;;  %p748_p11 = scmp.ge.s32.totalorder %s1006_s22, 1 }
  0x15   : > { %s186_s23 = scalar_lea.hbm %s1269_s0, %s747_s11  ;;  %s176_s27 = scalar_lea.sflag [#allocation4], %s175_s6 }
  0x16   : > { %s187_s25 = sshll.u32 %s186_s23, 4  ;;  %s1008_s30 = smov 384   ;;  %s188_s25 = int_to_ptr.hbm [resolvable:$true] %s187_s25 }
  0x17   : > { %s1009_s26 = smov 128   ;;  %s1010_s5 = smov 8  }
  0x18   : > { %839 = dma.hbm_to_vmem [thread:$0]  (!%p837_p10), %s188_s25, 512, %s190_s13, %s176_s27, %s1008_s30, %s1009_s26, %s1010_s5  }
  0x19   : > { %p206_p12 = scmp.lt.s32.totalorder %s1006_s22, 10 }
  0x1b   : > { %p207_p13 = pnand %p748_p11, %p206_p12 }
  0x1c   : > { %s212_s7 = sand.u32 (!%p207_p13), 1, %s982_s16  }
  0x1d   : > { %210 = sbr.rel (%p207_p13) target bundleno = 426 (0x1aa), region = 36  ;;  %s749_s8 = sshll.u32 (!%p207_p13), %s212_s7, 5 }
  0x1e   : > { %s213_s10 = scalar_lea.sflag (!%p207_p13), [#allocation4], %s212_s7  ;;  %s1117_s11 = scalar_lea.vmem (!%p207_p13), [#allocation3], %s749_s8 }
  0x22   : > { %973 = dma.done.wait (%p1094_p7), %s213_s10, 512  }
  0x23   : > { %975 = vsyncadd (%p1094_p7), %s213_s10, 4294966784  ;;  %s750_s28 = sshll.u32 %s990_s18, 4  ;;  %s752_s6 = sshll.u32 %s994_s19, 4 }
  0x24   : > { %p249_p0 = scmp.lt.s32.totalorder %s750_s28, 47  ;;  %p255_p1 = scmp.lt.s32.totalorder %s752_s6, 47 }
  0x25   : > { %p754_p2 = scmp.ne.s32.totalorder %s990_s18, 0 }
  0x26   : > { %s1293_s28 = smov (!%p249_p0, %s750_s28), 47  ;;  %s1295_s6 = smov (!%p255_p1, %s752_s6), 47 }
  0x27   : > { %s751_s25 = sshll.u32 %s1293_s28, 2  ;;  %s753_s15 = sshll.u32 %s1295_s6, 2 }
  0x28   : > { %s1128_s14 = scalar_lea.vmem %s1270_s1, %s751_s25  ;;  %s1133_s29 = scalar_lea.vmem %s1273_s4, %s753_s15 }
  0x29   : > { %264 = sbr.rel (%p754_p2) target bundleno = 63 (0x3f), region = 44 }
  0x2e   : > { %vm265_vm0 = vcmask 64512   ;;  %v1011_v0 = vmov 0.0  }
  0x2f   : > { %266 = vst.msk [vmem:[#allocation2] sm:$0xff] %vm265_vm0, %v1011_v0 }
  0x30   : > { %267 = vst.msk [vmem:[#allocation2 + $0x8] sm:$0xff] %vm265_vm0, %v1011_v0 }
  0x31   : > { %268 = vst.msk [vmem:[#allocation2 + $0x10] sm:$0xff] %vm265_vm0, %v1011_v0 }
  0x32   : > { %269 = vst.msk [vmem:[#allocation2 + $0x18] sm:$0xff] %vm265_vm0, %v1011_v0 }
  0x33   : > { %270 = vst.msk [vmem:[#allocation2 + $0x20] sm:$0xff] %vm265_vm0, %v1011_v0 }
  0x34   : > { %271 = vst.msk [vmem:[#allocation2 + $0x28] sm:$0xff] %vm265_vm0, %v1011_v0 }
  0x35   : > { %272 = vst.msk [vmem:[#allocation2 + $0x30] sm:$0xff] %vm265_vm0, %v1011_v0 }
  0x36   : > { %273 = vst.msk [vmem:[#allocation2 + $0x38] sm:$0xff] %vm265_vm0, %v1011_v0 }
  0x37   : > { %274 = vst.msk [vmem:[#allocation2 + $0x40] sm:$0xff] %vm265_vm0, %v1011_v0 }
  0x38   : > { %275 = vst.msk [vmem:[#allocation2 + $0x48] sm:$0xff] %vm265_vm0, %v1011_v0 }
  0x39   : > { %276 = vst.msk [vmem:[#allocation2 + $0x50] sm:$0xff] %vm265_vm0, %v1011_v0 }
  0x3a   : > { %277 = vst.msk [vmem:[#allocation2 + $0x58] sm:$0xff] %vm265_vm0, %v1011_v0 }
  0x3b   : > { %278 = vst.msk [vmem:[#allocation2 + $0x60] sm:$0xff] %vm265_vm0, %v1011_v0 }
  0x3c   : > { %279 = vst.msk [vmem:[#allocation2 + $0x68] sm:$0xff] %vm265_vm0, %v1011_v0 }
  0x3d   : > { %280 = vst.msk [vmem:[#allocation2 + $0x70] sm:$0xff] %vm265_vm0, %v1011_v0 }
  0x3e   : > { %281 = vst.msk [vmem:[#allocation2 + $0x78] sm:$0xff] %vm265_vm0, %v1011_v0 }
  0x3f PF: > { %v805_v1 = vld [vmem:[%s1128_s14 + $0x38] sm:$0xff]  ;;  %v804_v2 = vld [vmem:[%s1128_s14 + $0x30] sm:$0xff]  ;;  %v803_v3 = vld [vmem:[%s1128_s14 + $0x28] sm:$0xff]  ;;  %vm471_vm1 = vcmask 64512   ;;  %p787_p3 = scmp.ne.s32.totalorder %s990_s18, 2 }
  0x40   : > { %406 = vmatpush.bf16.msra.mxu0 %v805_v1  ;;  %806 = vmatpush.bf16.msra.mxu1 %v805_v1  ;;  %v802_v4 = vld [vmem:[%s1128_s14 + $0x20] sm:$0xff]  ;;  %v801_v5 = vld [vmem:[%s1128_s14 + $0x18] sm:$0xff]  ;;  %v800_v6 = vld [vmem:[%s1128_s14 + $0x10] sm:$0xff] }
  0x41   : > { %807 = vmatpush.bf16.msra.mxu2 %v805_v1  ;;  %808 = vmatpush.bf16.msra.mxu3 %v805_v1  ;;  %v282_v7 = vld [vmem:[%s1117_s11] sm:$0xff]  ;;  %v283_v8 = vld [vmem:[%s1117_s11 + $0x8] sm:$0xff]  ;;  %v284_v9 = vld [vmem:[%s1117_s11 + $0x10] sm:$0xff] }
  0x42   : > { %v285_v10 = vld [vmem:[%s1117_s11 + $0x18] sm:$0xff]  ;;  %v286_v11 = vunpack.c.0.s8 %v282_v7  ;;  %v287_v12 = vunpack.c.1.s8 %v282_v7  ;;  %v290_v13 = vunpack.c.0.s8 %v283_v8  ;;  %v291_v14 = vunpack.c.1.s8 %v283_v8  ;;  %v799_v15 = vld [vmem:[%s1128_s14 + $0x8] sm:$0xff]  ;;  %v798_v24 = vld [vmem:[%s1128_s14] sm:$0xff] }
  0x43   : > { %v294_v16 = vunpack.c.0.s8 %v284_v9  ;;  %v295_v17 = vunpack.c.1.s8 %v284_v9  ;;  %v298_v18 = vunpack.c.0.s8 %v285_v10  ;;  %v299_v19 = vunpack.c.1.s8 %v285_v10  ;;  %v326_v53 = vld [vmem:[#allocation2] sm:$0xff]  ;;  %v327_v61 = vld [vmem:[#allocation2 + $0x8] sm:$0xff] }
  0x44   : > { %407 = vmatpush.bf16.msra.mxu0 %v804_v2  ;;  %809 = vmatpush.bf16.msra.mxu1 %v804_v2  ;;  %v302_v20 = vcvt.s32.f32 %v286_v11  ;;  %v303_v21 = vcvt.s32.f32 %v287_v12  ;;  %v306_v22 = vcvt.s32.f32 %v290_v13  ;;  %v307_v23 = vcvt.s32.f32 %v291_v14  ;;  %v330_v54 = vld [vmem:[#allocation2 + $0x20] sm:$0xff]  ;;  %v331_v62 = vld [vmem:[#allocation2 + $0x28] sm:$0xff] }
  0x45   : > { %810 = vmatpush.bf16.msra.mxu2 %v804_v2  ;;  %811 = vmatpush.bf16.msra.mxu3 %v804_v2  ;;  %v310_v25 = vcvt.s32.f32 %v294_v16  ;;  %v311_v26 = vcvt.s32.f32 %v295_v17  ;;  %v314_v27 = vcvt.s32.f32 %v298_v18  ;;  %v315_v28 = vcvt.s32.f32 %v299_v19  ;;  %v334_v59 = vld [vmem:[#allocation2 + $0x40] sm:$0xff]  ;;  %v336_v19 = vld [vmem:[#allocation2 + $0x50] sm:$0xff] }
  0x46   : > { %v318_v29 = vpack.c.bf16 %v303_v21, %v302_v20  ;;  %v320_v30 = vpack.c.bf16 %v307_v23, %v306_v22  ;;  %v288_v33 = vunpack.c.2.s8 %v282_v7  ;;  %v289_v34 = vunpack.c.3.s8 %v282_v7  ;;  %v338_v60 = vld [vmem:[#allocation2 + $0x60] sm:$0xff]  ;;  %v335_v7 = vld [vmem:[#allocation2 + $0x48] sm:$0xff]  ;;  %v340_v20 = vld [vmem:[#allocation2 + $0x70] sm:$0xff] }
  0x47   : > { %v322_v31 = vpack.c.bf16 %v311_v26, %v310_v25  ;;  %v324_v32 = vpack.c.bf16 %v315_v28, %v314_v27  ;;  %v292_v35 = vunpack.c.2.s8 %v283_v8  ;;  %v293_v36 = vunpack.c.3.s8 %v283_v8  ;;  %v339_v8 = vld [vmem:[#allocation2 + $0x68] sm:$0xff]  ;;  %v329_v21 = vld [vmem:[#allocation2 + $0x18] sm:$0xff] }
  0x48   : > { %408 = vmatpush.bf16.msra.mxu0 %v803_v3  ;;  %812 = vmatpush.bf16.msra.mxu1 %v803_v3  ;;  %v296_v37 = vunpack.c.2.s8 %v284_v9  ;;  %v297_v38 = vunpack.c.3.s8 %v284_v9  ;;  %v300_v39 = vunpack.c.2.s8 %v285_v10  ;;  %v301_v40 = vunpack.c.3.s8 %v285_v10  ;;  %v328_v9 = vld [vmem:[#allocation2 + $0x10] sm:$0xff]  ;;  %v333_v22 = vld [vmem:[#allocation2 + $0x38] sm:$0xff] }
  0x49   : > { %813 = vmatpush.bf16.msra.mxu2 %v803_v3  ;;  %814 = vmatpush.bf16.msra.mxu3 %v803_v3  ;;  %v304_v41 = vcvt.s32.f32 %v288_v33  ;;  %v305_v42 = vcvt.s32.f32 %v289_v34  ;;  %v308_v43 = vcvt.s32.f32 %v292_v35  ;;  %v309_v44 = vcvt.s32.f32 %v293_v36  ;;  %v332_v10 = vld [vmem:[#allocation2 + $0x30] sm:$0xff] }
  0x4a   : > { %v312_v45 = vcvt.s32.f32 %v296_v37  ;;  %v313_v46 = vcvt.s32.f32 %v297_v38  ;;  %v316_v47 = vcvt.s32.f32 %v300_v39  ;;  %v317_v48 = vcvt.s32.f32 %v301_v40 }
  0x4b   : > { %v319_v49 = vpack.c.bf16 %v305_v42, %v304_v41  ;;  %v321_v50 = vpack.c.bf16 %v309_v44, %v308_v43 }
  0x4c   : > { %409 = vmatpush.bf16.msra.mxu0 %v802_v4  ;;  %815 = vmatpush.bf16.msra.mxu1 %v802_v4  ;;  %v323_v51 = vpack.c.bf16 %v313_v46, %v312_v45  ;;  %v325_v52 = vpack.c.bf16 %v317_v48, %v316_v47 }
  0x4d   : > { %816 = vmatpush.bf16.msra.mxu2 %v802_v4  ;;  %817 = vmatpush.bf16.msra.mxu3 %v802_v4 }
  0x50   : > { %410 = vmatpush.bf16.msra.mxu0 %v801_v5  ;;  %818 = vmatpush.bf16.msra.mxu1 %v801_v5 }
  0x51   : > { %819 = vmatpush.bf16.msra.mxu2 %v801_v5  ;;  %820 = vmatpush.bf16.msra.mxu3 %v801_v5 }
  0x54   : > { %411 = vmatpush.bf16.msra.mxu0 %v800_v6  ;;  %821 = vmatpush.bf16.msra.mxu1 %v800_v6 }
  0x55   : > { %822 = vmatpush.bf16.msra.mxu2 %v800_v6  ;;  %823 = vmatpush.bf16.msra.mxu3 %v800_v6 }
  0x58   : > { %412 = vmatpush.bf16.msra.mxu0 %v799_v15  ;;  %824 = vmatpush.bf16.msra.mxu1 %v799_v15 }
  0x59   : > { %825 = vmatpush.bf16.msra.mxu2 %v799_v15  ;;  %826 = vmatpush.bf16.msra.mxu3 %v799_v15 }
  0x5c   : > { %413 = vmatpush.bf16.msra.mxu0 %v798_v24  ;;  %827 = vmatpush.bf16.msra.mxu1 %v798_v24 }
  0x5d   : > { %828 = vmatpush.bf16.msra.mxu2 %v798_v24  ;;  %829 = vmatpush.bf16.msra.mxu3 %v798_v24 }
  0x5f   : > { %414 = vmatmul.bf16.vlgmr.msra.gmra.mxu0 %v318_v29  ;;  %424 = vmatmul.bf16.vlgmr.msra.gmra.mxu1 %v320_v30 }
  0x60   : > { %434 = vmatmul.bf16.vlgmr.msra.gmra.mxu2 %v322_v31  ;;  %444 = vmatmul.bf16.vlgmr.msra.gmra.mxu3 %v324_v32  ;;  %v337_v31 = vld [vmem:[#allocation2 + $0x58] sm:$0xff] }
  0x61   : > { %v341_v32 = vld [vmem:[#allocation2 + $0x78] sm:$0xff] }
  0x6f   : > { %419 = vmatmul.bf16.gmra.mxu0 %v319_v49  ;;  %429 = vmatmul.bf16.gmra.mxu1 %v321_v50 }
  0x70   : > { %439 = vmatmul.bf16.gmra.mxu2 %v323_v51  ;;  %449 = vmatmul.bf16.gmra.mxu3 %v325_v52 }
  0xdc   : > { %v415_v55 = vpop.f32.mrf.mxu0  ;;  %v425_v56 = vpop.f32.mrf.mxu1 }
  0xdd   : > { %v455_v57 = vadd.f32 %v415_v55, %v326_v53  ;;  %v459_v58 = vadd.f32 %v425_v56, %v330_v54 }
  0xdf   : > { %472 = vst.msk [vmem:[#allocation2] sm:$0xff] %vm471_vm1, %v455_v57 }
  0xe0   : > { %476 = vst.msk [vmem:[#allocation2 + $0x20] sm:$0xff] %vm471_vm1, %v459_v58 }
  0xe3   : > { %v435_v63 = vpop.f32.mrf.mxu2  ;;  %v445_v0 = vpop.f32.mrf.mxu3 }
  0xe4   : > { %v463_v1 = vadd.f32 %v435_v63, %v334_v59  ;;  %v467_v2 = vadd.f32 %v445_v0, %v338_v60  ;;  %v417_v3 = vpop.f32.mrf.mxu0  ;;  %v427_v4 = vpop.f32.mrf.mxu1 }
  0xe5   : > { %v456_v5 = vadd.f32 %v417_v3, %v327_v61  ;;  %v460_v6 = vadd.f32 %v427_v4, %v331_v62 }
  0xe6   : > { %480 = vst.msk [vmem:[#allocation2 + $0x40] sm:$0xff] %vm471_vm1, %v463_v1 }
  0xe7   : > { %484 = vst.msk [vmem:[#allocation2 + $0x60] sm:$0xff] %vm471_vm1, %v467_v2 }
  0xe8   : > { %473 = vst.msk [vmem:[#allocation2 + $0x8] sm:$0xff] %vm471_vm1, %v456_v5 }
  0xe9   : > { %477 = vst.msk [vmem:[#allocation2 + $0x28] sm:$0xff] %vm471_vm1, %v460_v6 }
  0xeb   : > { %v437_v11 = vpop.f32.mrf.mxu2  ;;  %v447_v12 = vpop.f32.mrf.mxu3 }
  0xec   : > { %v464_v13 = vadd.f32 %v437_v11, %v335_v7  ;;  %v468_v14 = vadd.f32 %v447_v12, %v339_v8  ;;  %v420_v15 = vpop.f32.mrf.mxu0  ;;  %v430_v16 = vpop.f32.mrf.mxu1 }
  0xed   : > { %v457_v17 = vadd.f32 %v420_v15, %v328_v9  ;;  %v461_v18 = vadd.f32 %v430_v16, %v332_v10 }
  0xee   : > { %481 = vst.msk [vmem:[#allocation2 + $0x48] sm:$0xff] %vm471_vm1, %v464_v13 }
  0xef   : > { %485 = vst.msk [vmem:[#allocation2 + $0x68] sm:$0xff] %vm471_vm1, %v468_v14 }
  0xf0   : > { %474 = vst.msk [vmem:[#allocation2 + $0x10] sm:$0xff] %vm471_vm1, %v457_v17 }
  0xf1   : > { %478 = vst.msk [vmem:[#allocation2 + $0x30] sm:$0xff] %vm471_vm1, %v461_v18 }
  0xf3   : > { %v440_v23 = vpop.f32.mrf.mxu2  ;;  %v450_v24 = vpop.f32.mrf.mxu3 }
  0xf4   : > { %v465_v25 = vadd.f32 %v440_v23, %v336_v19  ;;  %v469_v26 = vadd.f32 %v450_v24, %v340_v20  ;;  %v422_v27 = vpop.f32.mrf.mxu0  ;;  %v432_v28 = vpop.f32.mrf.mxu1 }
  0xf5   : > { %v458_v29 = vadd.f32 %v422_v27, %v329_v21  ;;  %v462_v30 = vadd.f32 %v432_v28, %v333_v22 }
  0xf6   : > { %482 = vst.msk [vmem:[#allocation2 + $0x50] sm:$0xff] %vm471_vm1, %v465_v25 }
  0xf7   : > { %486 = vst.msk [vmem:[#allocation2 + $0x70] sm:$0xff] %vm471_vm1, %v469_v26 }
  0xf8   : > { %475 = vst.msk [vmem:[#allocation2 + $0x18] sm:$0xff] %vm471_vm1, %v458_v29 }
  0xf9   : > { %479 = vst.msk [vmem:[#allocation2 + $0x38] sm:$0xff] %vm471_vm1, %v462_v30 }
  0xfb   : > { %v442_v33 = vpop.f32.mrf.mxu2  ;;  %v452_v34 = vpop.f32.mrf.mxu3  ;;  %491 = sbr.rel (%p787_p3) target bundleno = 426 (0x1aa), region = 48 }
  0xfc   : > { %v466_v35 = vadd.f32 %v442_v33, %v337_v31  ;;  %v470_v36 = vadd.f32 %v452_v34, %v341_v32 }
  0xfe   : > { %483 = vst.msk [vmem:[#allocation2 + $0x58] sm:$0xff] %vm471_vm1, %v466_v35 }
  0xff   : > { %487 = vst.msk [vmem:[#allocation2 + $0x78] sm:$0xff] %vm471_vm1, %v470_v36 }
 0x100   : > { %v516_v37 = vld [vmem:[%s1271_s2] sm:$0xf]  ;;  %vm545_vm2 = vcmask 1043456   ;;  %v493_v39 = vld [vmem:[#allocation2 + $0x8] sm:$0xff]  ;;  %v494_v51 = vld [vmem:[#allocation2 + $0x10] sm:$0xff]  ;;  %vm630_vm3 = vcmask 257024  }
 0x101   : > { %v492_v38 = vld [vmem:[#allocation2] sm:$0xff]  ;;  %v547_v40 = vsel %vm545_vm2, %v516_v37, 0  ;;  %v497_v43 = vld [vmem:[#allocation2 + $0x28] sm:$0xff]  ;;  %v495_v52 = vld [vmem:[#allocation2 + $0x18] sm:$0xff] }
 0x102   : > { %v508_v41 = vpack.c.bf16 %v493_v39, %v492_v38  ;;  %v496_v42 = vld [vmem:[#allocation2 + $0x20] sm:$0xff]  ;;  %556 = vmatpush.bf16.msra.mxu0 %v547_v40  ;;  %830 = vmatpush.bf16.msra.mxu1 %v547_v40  ;;  %v501_v46 = vld [vmem:[#allocation2 + $0x48] sm:$0xff]  ;;  %v498_v53 = vld [vmem:[#allocation2 + $0x30] sm:$0xff]  ;;  %v509_v59 = vpack.c.bf16 %v495_v52, %v494_v51 }
 0x103   : > { %v500_v44 = vld [vmem:[#allocation2 + $0x40] sm:$0xff]  ;;  %v510_v45 = vpack.c.bf16 %v497_v43, %v496_v42  ;;  %v505_v48 = vld [vmem:[#allocation2 + $0x68] sm:$0xff]  ;;  %831 = vmatpush.bf16.msra.mxu2 %v547_v40  ;;  %832 = vmatpush.bf16.msra.mxu3 %v547_v40  ;;  %v499_v54 = vld [vmem:[#allocation2 + $0x38] sm:$0xff] }
 0x104   : > { %v504_v47 = vld [vmem:[#allocation2 + $0x60] sm:$0xff]  ;;  %v512_v49 = vpack.c.bf16 %v501_v46, %v500_v44  ;;  %v502_v55 = vld [vmem:[#allocation2 + $0x50] sm:$0xff]  ;;  %v511_v60 = vpack.c.bf16 %v499_v54, %v498_v53 }
 0x105   : > { %v514_v50 = vpack.c.bf16 %v505_v48, %v504_v47  ;;  %788 = vmatmul.msk.bf16.vlgmr.msra.gmra.mxu0 %vm471_vm1, %v508_v41  ;;  %790 = vmatmul.msk.bf16.vlgmr.msra.gmra.mxu1 %vm471_vm1, %v510_v45  ;;  %v503_v56 = vld [vmem:[#allocation2 + $0x58] sm:$0xff]  ;;  %v506_v57 = vld [vmem:[#allocation2 + $0x70] sm:$0xff]  ;;  %v1195_v63 = vld [vmem:[%s1272_s3] ss:$0 sm:$0xff] }
 0x106   : > { %792 = vmatmul.msk.bf16.vlgmr.msra.gmra.mxu2 %vm471_vm1, %v512_v49  ;;  %v507_v58 = vld [vmem:[#allocation2 + $0x78] sm:$0xff]  ;;  %v513_v61 = vpack.c.bf16 %v503_v56, %v502_v55 }
 0x107   : > { %794 = vmatmul.msk.bf16.vlgmr.msra.gmra.mxu3 %vm471_vm1, %v514_v50  ;;  %v515_v62 = vpack.c.bf16 %v507_v58, %v506_v57 }
 0x115   : > { %789 = vmatmul.msk.bf16.gmra.mxu0 %vm471_vm1, %v509_v59  ;;  %791 = vmatmul.msk.bf16.gmra.mxu1 %vm471_vm1, %v511_v60 }
 0x116   : > { %793 = vmatmul.msk.bf16.gmra.mxu2 %vm471_vm1, %v513_v61 }
 0x117   : > { %795 = vmatmul.msk.bf16.gmra.mxu3 %vm471_vm1, %v515_v62 }
 0x182   : > { %v558_v0 = vpop.f32.mrf.mxu0  ;;  %v568_v1 = vpop.f32.mrf.mxu1 }
 0x183   : > { %v559_v2 = vadd.f32 %v1195_v63, %v558_v0  ;;  %v569_v3 = vadd.f32 %v1195_v63, %v568_v1 }
 0x185   : > { %v598_v4 = vmax.f32 %v559_v2, 0.0  ;;  %v602_v5 = vmax.f32 %v569_v3, 0.0 }
 0x187   : > { %v614_v6 = vpack.c.bf16 %v598_v4, %v598_v4  ;;  %v618_v7 = vpack.c.bf16 %v602_v5, %v602_v5 }
 0x189   : > { %631 = vst.msk [vmem:[%s1133_s29] sm:$0xf] %vm630_vm3, %v614_v6  ;;  %v578_v8 = vpop.f32.mrf.mxu2 }
 0x18a   : > { %v588_v9 = vpop.f32.mrf.mxu3  ;;  %635 = vst.msk [vmem:[%s1133_s29 + $0x10] sm:$0xf] %vm630_vm3, %v618_v7  ;;  %v579_v10 = vadd.f32 %v1195_v63, %v578_v8  ;;  %v560_v12 = vpop.f32.mrf.mxu0 }
 0x18b   : > { %v589_v11 = vadd.f32 %v1195_v63, %v588_v9  ;;  %v570_v13 = vpop.f32.mrf.mxu1  ;;  %v561_v14 = vadd.f32 %v1195_v63, %v560_v12 }
 0x18c   : > { %v571_v15 = vadd.f32 %v1195_v63, %v570_v13  ;;  %v606_v16 = vmax.f32 %v579_v10, 0.0 }
 0x18d   : > { %v610_v17 = vmax.f32 %v589_v11, 0.0  ;;  %v599_v18 = vmax.f32 %v561_v14, 0.0 }
 0x18e   : > { %v603_v19 = vmax.f32 %v571_v15, 0.0  ;;  %v622_v20 = vpack.c.bf16 %v606_v16, %v606_v16 }
 0x18f   : > { %v626_v21 = vpack.c.bf16 %v610_v17, %v610_v17  ;;  %v615_v22 = vpack.c.bf16 %v599_v18, %v599_v18 }
 0x190   : > { %v619_v23 = vpack.c.bf16 %v603_v19, %v603_v19  ;;  %639 = vst.msk [vmem:[%s1133_s29 + $0x20] sm:$0xf] %vm630_vm3, %v622_v20 }
 0x191   : > { %643 = vst.msk [vmem:[%s1133_s29 + $0x30] sm:$0xf] %vm630_vm3, %v626_v21  ;;  %v580_v24 = vpop.f32.mrf.mxu2 }
 0x192   : > { %v590_v25 = vpop.f32.mrf.mxu3  ;;  %632 = vst.msk [vmem:[%s1133_s29 + $0x4] sm:$0xf] %vm630_vm3, %v615_v22  ;;  %v581_v26 = vadd.f32 %v1195_v63, %v580_v24  ;;  %v563_v28 = vpop.f32.mrf.mxu0 }
 0x193   : > { %v591_v27 = vadd.f32 %v1195_v63, %v590_v25  ;;  %v573_v29 = vpop.f32.mrf.mxu1  ;;  %636 = vst.msk [vmem:[%s1133_s29 + $0x14] sm:$0xf] %vm630_vm3, %v619_v23  ;;  %v564_v30 = vadd.f32 %v1195_v63, %v563_v28 }
 0x194   : > { %v574_v31 = vadd.f32 %v1195_v63, %v573_v29  ;;  %v607_v32 = vmax.f32 %v581_v26, 0.0 }
 0x195   : > { %v611_v33 = vmax.f32 %v591_v27, 0.0  ;;  %v600_v34 = vmax.f32 %v564_v30, 0.0 }
 0x196   : > { %v604_v35 = vmax.f32 %v574_v31, 0.0  ;;  %v623_v36 = vpack.c.bf16 %v607_v32, %v607_v32 }
 0x197   : > { %v627_v37 = vpack.c.bf16 %v611_v33, %v611_v33  ;;  %v616_v38 = vpack.c.bf16 %v600_v34, %v600_v34 }
 0x198   : > { %v620_v39 = vpack.c.bf16 %v604_v35, %v604_v35  ;;  %640 = vst.msk [vmem:[%s1133_s29 + $0x24] sm:$0xf] %vm630_vm3, %v623_v36 }
 0x199   : > { %644 = vst.msk [vmem:[%s1133_s29 + $0x34] sm:$0xf] %vm630_vm3, %v627_v37  ;;  %v583_v40 = vpop.f32.mrf.mxu2 }
 0x19a   : > { %v593_v41 = vpop.f32.mrf.mxu3  ;;  %633 = vst.msk [vmem:[%s1133_s29 + $0x8] sm:$0xf] %vm630_vm3, %v616_v38  ;;  %v584_v42 = vadd.f32 %v1195_v63, %v583_v40  ;;  %v565_v44 = vpop.f32.mrf.mxu0 }
 0x19b   : > { %v594_v43 = vadd.f32 %v1195_v63, %v593_v41  ;;  %v575_v45 = vpop.f32.mrf.mxu1  ;;  %637 = vst.msk [vmem:[%s1133_s29 + $0x18] sm:$0xf] %vm630_vm3, %v620_v39  ;;  %v566_v46 = vadd.f32 %v1195_v63, %v565_v44 }
 0x19c   : > { %v576_v47 = vadd.f32 %v1195_v63, %v575_v45  ;;  %v608_v48 = vmax.f32 %v584_v42, 0.0 }
 0x19d   : > { %v612_v49 = vmax.f32 %v594_v43, 0.0  ;;  %v601_v50 = vmax.f32 %v566_v46, 0.0 }
 0x19e   : > { %v605_v51 = vmax.f32 %v576_v47, 0.0  ;;  %v624_v52 = vpack.c.bf16 %v608_v48, %v608_v48 }
 0x19f   : > { %v628_v53 = vpack.c.bf16 %v612_v49, %v612_v49  ;;  %v617_v54 = vpack.c.bf16 %v601_v50, %v601_v50 }
 0x1a0   : > { %v621_v55 = vpack.c.bf16 %v605_v51, %v605_v51  ;;  %641 = vst.msk [vmem:[%s1133_s29 + $0x28] sm:$0xf] %vm630_vm3, %v624_v52 }
 0x1a1   : > { %645 = vst.msk [vmem:[%s1133_s29 + $0x38] sm:$0xf] %vm630_vm3, %v628_v53  ;;  %v585_v56 = vpop.f32.mrf.mxu2 }
 0x1a2   : > { %v595_v57 = vpop.f32.mrf.mxu3  ;;  %634 = vst.msk [vmem:[%s1133_s29 + $0xc] sm:$0xf] %vm630_vm3, %v617_v54  ;;  %v586_v58 = vadd.f32 %v1195_v63, %v585_v56 }
 0x1a3   : > { %v596_v59 = vadd.f32 %v1195_v63, %v595_v57  ;;  %638 = vst.msk [vmem:[%s1133_s29 + $0x1c] sm:$0xf] %vm630_vm3, %v621_v55 }
 0x1a4   : > { %v609_v60 = vmax.f32 %v586_v58, 0.0 }
 0x1a5   : > { %v613_v61 = vmax.f32 %v596_v59, 0.0 }
 0x1a6   : > { %v625_v62 = vpack.c.bf16 %v609_v60, %v609_v60 }
 0x1a7   : > { %v629_v0 = vpack.c.bf16 %v613_v61, %v613_v61 }
 0x1a8   : > { %642 = vst.msk [vmem:[%s1133_s29 + $0x2c] sm:$0xf] %vm630_vm3, %v625_v62 }
 0x1a9   : > { %646 = vst.msk [vmem:[%s1133_s29 + $0x3c] sm:$0xf] %vm630_vm3, %v629_v0 }
 0x1aa PF: > { %s17_s22 = sadd.s32 1, %s1006_s22   ;;  %s1278_s5 = sld [smem:[#allocation6_spill]] }
 0x1ab   : > { %p14_p4 = scmp.ge.s32.totalorder %s17_s22, 11   ;;  %s1279_s15 = smov %s982_s16 }
 0x1ac   : > { %s1280_s16 = smov %s986_s17  ;;  %s1281_s17 = smov %s1104_s9 }
 0x1ad   : > { %s1282_s18 = smov %s998_s20  ;;  %s1283_s19 = smov %s1002_s21 }
 0x1ae   : > { %s1284_s20 = smov %s1287_s24  ;;  %16 = sbr.rel (!%p14_p4) target bundleno = 5 (0x5), region = 87 }
 0x1b0   : > { %s1285_s21 = smov %s1278_s5 }
 0x1b3   :  { %669 = vsyncpa [#allocation4], 1 }
 0x1b4   :  { %671 = vsyncpa [#allocation4 + $0x1], 1 }

</bundles_post_ra>
